<compile_context>
chip_gen: v7x
topology: tpu7x:2x2x1
jax: 0.10.0
libtpu: 0.0.40
codegen_flags: <defaults>
</compile_context>

<pallas_src>
import jax
import jax.numpy as jnp
from jax.experimental import pallas as pl
from jax.experimental.pallas import tpu as pltpu

WORLD = 4           # number of simulated ranks (== len(split_sizes))
CHUNK_SUB = 8       # sublane extent of one chunk payload
CHUNK_LANE = 128    # lane extent of one chunk payload


def _a2a_kernel(in_ref, out_ref, sem):
    # in_ref / out_ref live in HBM (memory_space=pl.ANY): no VMEM staging.
    # One coalesced DMA per destination rank:
    #   out[dst, :, ...] = in[:, dst, ...]
    # (strided read across the source ranks, contiguous write of one rank's
    #  full output).  All WORLD destination regions are disjoint, so the DMAs
    # run fully concurrently; drain the WORLD semaphores afterwards.
    copies = []
    for dst in range(WORLD):
        cp = pltpu.make_async_copy(
            in_ref.at[:, dst],    # chunk `dst` from every source rank: (WORLD, 8, 128)
            out_ref.at[dst],      # full output of destination rank `dst`: (WORLD, 8, 128)
            sem.at[dst],
        )
        cp.start()
        copies.append(cp)
    for cp in copies:
        cp.wait()


def all_to_all_single(x):
    """Simulated dist.all_to_all_single(output_split=[1]*4, input_split=[1]*4).

    x:   [WORLD, WORLD, CHUNK_SUB, CHUNK_LANE]  (per-rank inputs stacked on axis 0)
    out: [WORLD, WORLD, CHUNK_SUB, CHUNK_LANE]  (per-rank outputs stacked on axis 0)
    out[dst, src] = x[src, dst]
    """
    assert x.shape == (WORLD, WORLD, CHUNK_SUB, CHUNK_LANE), x.shape

    return pl.pallas_call(
        _a2a_kernel,
        out_shape=jax.ShapeDtypeStruct(x.shape, x.dtype),
        # Both operands stay in HBM; the kernel drives the DMAs itself.
        # NOTE: do NOT alias input/output here -- the diagonal (src==dst)
        # regions would then be read and written concurrently.
        in_specs=[pl.BlockSpec(memory_space=pl.ANY)],
        out_specs=pl.BlockSpec(memory_space=pl.ANY),
        scratch_shapes=[pltpu.SemaphoreType.DMA((WORLD,))],
    )(x)


if __name__ == "__main__":
    key = jax.random.PRNGKey(0)
    # Per-rank input: [chunk=4, 8, 128]; stacked over the simulated world.
    x = jax.random.normal(
        key, (WORLD, WORLD, CHUNK_SUB, CHUNK_LANE), dtype=jnp.float32
    )

    out = all_to_all_single(x)
    out = jax.block_until_ready(out)

    # Reference semantics of all_to_all_single with unit splits:
    # output of rank r, slot s  ==  input of rank s, chunk r.
    ref = jnp.swapaxes(x, 0, 1)
    assert out.shape == x.shape and out.dtype == x.dtype
    assert jnp.array_equal(out, ref), "all_to_all_single mismatch"

    print("KERNEL_OK")
</pallas_src>

<mosaic_0001>
module attributes {stable_mosaic.version = 11 : i64} {
  func.func @_a2a_kernel(%arg0: memref<4x4x8x128xf32, #tpu.memory_space<any>>, %arg1: memref<4x4x8x128xf32, #tpu.memory_space<any>>, %arg2: memref<4x!tpu.dma_semaphore, #tpu.memory_space<semaphore_mem>>) attributes {dimension_semantics = [], scalar_prefetch = 0 : i64, scratch_operands = 1 : i64, tpu.core_type = #tpu.core_type<tc>} {
    %c0_i32 = arith.constant 0 : i32
    %c0_i32_0 = arith.constant 0 : i32
    %c0_i32_1 = arith.constant 0 : i32
    %c0_i32_2 = arith.constant 0 : i32
    %c0_i32_3 = arith.constant 0 : i32
    %c0_i32_4 = arith.constant 0 : i32
    %0 = tpu.memref_slice %arg0[%c0_i32_2, %c0_i32, %c0_i32_3, %c0_i32_4] : memref<4x4x8x128xf32, #tpu.memory_space<any>> -> memref<4x1x8x128xf32, #tpu.memory_space<any>>
    %1 = tpu.memref_squeeze %0 : memref<4x1x8x128xf32, #tpu.memory_space<any>> -> memref<4x8x128xf32, #tpu.memory_space<any>>
    %c0_i32_5 = arith.constant 0 : i32
    %c0_i32_6 = arith.constant 0 : i32
    %c0_i32_7 = arith.constant 0 : i32
    %2 = tpu.memref_slice %arg1[%c0_i32_0, %c0_i32_5, %c0_i32_6, %c0_i32_7] : memref<4x4x8x128xf32, #tpu.memory_space<any>> -> memref<1x4x8x128xf32, #tpu.memory_space<any>>
    %3 = tpu.memref_squeeze %2 : memref<1x4x8x128xf32, #tpu.memory_space<any>> -> memref<4x8x128xf32, #tpu.memory_space<any>>
    %4 = tpu.memref_slice %arg2[%c0_i32_1] : memref<4x!tpu.dma_semaphore, #tpu.memory_space<semaphore_mem>> -> memref<1x!tpu.dma_semaphore, #tpu.memory_space<semaphore_mem>>
    %5 = tpu.memref_squeeze %4 : memref<1x!tpu.dma_semaphore, #tpu.memory_space<semaphore_mem>> -> memref<!tpu.dma_semaphore, #tpu.memory_space<semaphore_mem>>
    tpu.enqueue_dma source(%1 : memref<4x8x128xf32, #tpu.memory_space<any>>) target(%3 : memref<4x8x128xf32, #tpu.memory_space<any>>) target_semaphore(%5 : memref<!tpu.dma_semaphore, #tpu.memory_space<semaphore_mem>>)
    %c1_i32 = arith.constant 1 : i32
    %c1_i32_8 = arith.constant 1 : i32
    %c1_i32_9 = arith.constant 1 : i32
    %c0_i32_10 = arith.constant 0 : i32
    %c0_i32_11 = arith.constant 0 : i32
    %c0_i32_12 = arith.constant 0 : i32
    %6 = tpu.memref_slice %arg0[%c0_i32_10, %c1_i32, %c0_i32_11, %c0_i32_12] : memref<4x4x8x128xf32, #tpu.memory_space<any>> -> memref<4x1x8x128xf32, #tpu.memory_space<any>>
    %7 = tpu.memref_squeeze %6 : memref<4x1x8x128xf32, #tpu.memory_space<any>> -> memref<4x8x128xf32, #tpu.memory_space<any>>
    %c0_i32_13 = arith.constant 0 : i32
    %c0_i32_14 = arith.constant 0 : i32
    %c0_i32_15 = arith.constant 0 : i32
    %8 = tpu.memref_slice %arg1[%c1_i32_8, %c0_i32_13, %c0_i32_14, %c0_i32_15] : memref<4x4x8x128xf32, #tpu.memory_space<any>> -> memref<1x4x8x128xf32, #tpu.memory_space<any>>
    %9 = tpu.memref_squeeze %8 : memref<1x4x8x128xf32, #tpu.memory_space<any>> -> memref<4x8x128xf32, #tpu.memory_space<any>>
    %10 = tpu.memref_slice %arg2[%c1_i32_9] : memref<4x!tpu.dma_semaphore, #tpu.memory_space<semaphore_mem>> -> memref<1x!tpu.dma_semaphore, #tpu.memory_space<semaphore_mem>>
    %11 = tpu.memref_squeeze %10 : memref<1x!tpu.dma_semaphore, #tpu.memory_space<semaphore_mem>> -> memref<!tpu.dma_semaphore, #tpu.memory_space<semaphore_mem>>
    tpu.enqueue_dma source(%7 : memref<4x8x128xf32, #tpu.memory_space<any>>) target(%9 : memref<4x8x128xf32, #tpu.memory_space<any>>) target_semaphore(%11 : memref<!tpu.dma_semaphore, #tpu.memory_space<semaphore_mem>>)
    %c2_i32 = arith.constant 2 : i32
    %c2_i32_16 = arith.constant 2 : i32
    %c2_i32_17 = arith.constant 2 : i32
    %c0_i32_18 = arith.constant 0 : i32
    %c0_i32_19 = arith.constant 0 : i32
    %c0_i32_20 = arith.constant 0 : i32
    %12 = tpu.memref_slice %arg0[%c0_i32_18, %c2_i32, %c0_i32_19, %c0_i32_20] : memref<4x4x8x128xf32, #tpu.memory_space<any>> -> memref<4x1x8x128xf32, #tpu.memory_space<any>>
    %13 = tpu.memref_squeeze %12 : memref<4x1x8x128xf32, #tpu.memory_space<any>> -> memref<4x8x128xf32, #tpu.memory_space<any>>
    %c0_i32_21 = arith.constant 0 : i32
    %c0_i32_22 = arith.constant 0 : i32
    %c0_i32_23 = arith.constant 0 : i32
    %14 = tpu.memref_slice %arg1[%c2_i32_16, %c0_i32_21, %c0_i32_22, %c0_i32_23] : memref<4x4x8x128xf32, #tpu.memory_space<any>> -> memref<1x4x8x128xf32, #tpu.memory_space<any>>
    %15 = tpu.memref_squeeze %14 : memref<1x4x8x128xf32, #tpu.memory_space<any>> -> memref<4x8x128xf32, #tpu.memory_space<any>>
    %16 = tpu.memref_slice %arg2[%c2_i32_17] : memref<4x!tpu.dma_semaphore, #tpu.memory_space<semaphore_mem>> -> memref<1x!tpu.dma_semaphore, #tpu.memory_space<semaphore_mem>>
    %17 = tpu.memref_squeeze %16 : memref<1x!tpu.dma_semaphore, #tpu.memory_space<semaphore_mem>> -> memref<!tpu.dma_semaphore, #tpu.memory_space<semaphore_mem>>
    tpu.enqueue_dma source(%13 : memref<4x8x128xf32, #tpu.memory_space<any>>) target(%15 : memref<4x8x128xf32, #tpu.memory_space<any>>) target_semaphore(%17 : memref<!tpu.dma_semaphore, #tpu.memory_space<semaphore_mem>>)
    %c3_i32 = arith.constant 3 : i32
    %c3_i32_24 = arith.constant 3 : i32
    %c3_i32_25 = arith.constant 3 : i32
    %c0_i32_26 = arith.constant 0 : i32
    %c0_i32_27 = arith.constant 0 : i32
    %c0_i32_28 = arith.constant 0 : i32
    %18 = tpu.memref_slice %arg0[%c0_i32_26, %c3_i32, %c0_i32_27, %c0_i32_28] : memref<4x4x8x128xf32, #tpu.memory_space<any>> -> memref<4x1x8x128xf32, #tpu.memory_space<any>>
    %19 = tpu.memref_squeeze %18 : memref<4x1x8x128xf32, #tpu.memory_space<any>> -> memref<4x8x128xf32, #tpu.memory_space<any>>
    %c0_i32_29 = arith.constant 0 : i32
    %c0_i32_30 = arith.constant 0 : i32
    %c0_i32_31 = arith.constant 0 : i32
    %20 = tpu.memref_slice %arg1[%c3_i32_24, %c0_i32_29, %c0_i32_30, %c0_i32_31] : memref<4x4x8x128xf32, #tpu.memory_space<any>> -> memref<1x4x8x128xf32, #tpu.memory_space<any>>
    %21 = tpu.memref_squeeze %20 : memref<1x4x8x128xf32, #tpu.memory_space<any>> -> memref<4x8x128xf32, #tpu.memory_space<any>>
    %22 = tpu.memref_slice %arg2[%c3_i32_25] : memref<4x!tpu.dma_semaphore, #tpu.memory_space<semaphore_mem>> -> memref<1x!tpu.dma_semaphore, #tpu.memory_space<semaphore_mem>>
    %23 = tpu.memref_squeeze %22 : memref<1x!tpu.dma_semaphore, #tpu.memory_space<semaphore_mem>> -> memref<!tpu.dma_semaphore, #tpu.memory_space<semaphore_mem>>
    tpu.enqueue_dma source(%19 : memref<4x8x128xf32, #tpu.memory_space<any>>) target(%21 : memref<4x8x128xf32, #tpu.memory_space<any>>) target_semaphore(%23 : memref<!tpu.dma_semaphore, #tpu.memory_space<semaphore_mem>>)
    %c0_i32_32 = arith.constant 0 : i32
    %c0_i32_33 = arith.constant 0 : i32
    %c0_i32_34 = arith.constant 0 : i32
    %c0_i32_35 = arith.constant 0 : i32
    %c0_i32_36 = arith.constant 0 : i32
    %c0_i32_37 = arith.constant 0 : i32
    %24 = tpu.memref_slice %arg0[%c0_i32_35, %c0_i32_32, %c0_i32_36, %c0_i32_37] : memref<4x4x8x128xf32, #tpu.memory_space<any>> -> memref<4x1x8x128xf32, #tpu.memory_space<any>>
    %25 = tpu.memref_squeeze %24 : memref<4x1x8x128xf32, #tpu.memory_space<any>> -> memref<4x8x128xf32, #tpu.memory_space<any>>
    %c0_i32_38 = arith.constant 0 : i32
    %c0_i32_39 = arith.constant 0 : i32
    %c0_i32_40 = arith.constant 0 : i32
    %26 = tpu.memref_slice %arg1[%c0_i32_33, %c0_i32_38, %c0_i32_39, %c0_i32_40] : memref<4x4x8x128xf32, #tpu.memory_space<any>> -> memref<1x4x8x128xf32, #tpu.memory_space<any>>
    %27 = tpu.memref_squeeze %26 : memref<1x4x8x128xf32, #tpu.memory_space<any>> -> memref<4x8x128xf32, #tpu.memory_space<any>>
    %28 = tpu.memref_slice %arg2[%c0_i32_34] : memref<4x!tpu.dma_semaphore, #tpu.memory_space<semaphore_mem>> -> memref<1x!tpu.dma_semaphore, #tpu.memory_space<semaphore_mem>>
    %29 = tpu.memref_squeeze %28 : memref<1x!tpu.dma_semaphore, #tpu.memory_space<semaphore_mem>> -> memref<!tpu.dma_semaphore, #tpu.memory_space<semaphore_mem>>
    tpu.wait_dma2 semaphore(%29 : memref<!tpu.dma_semaphore, #tpu.memory_space<semaphore_mem>>) src(%25 : memref<4x8x128xf32, #tpu.memory_space<any>>) dst(%27 : memref<4x8x128xf32, #tpu.memory_space<any>>)
    %c1_i32_41 = arith.constant 1 : i32
    %c1_i32_42 = arith.constant 1 : i32
    %c1_i32_43 = arith.constant 1 : i32
    %c0_i32_44 = arith.constant 0 : i32
    %c0_i32_45 = arith.constant 0 : i32
    %c0_i32_46 = arith.constant 0 : i32
    %30 = tpu.memref_slice %arg0[%c0_i32_44, %c1_i32_41, %c0_i32_45, %c0_i32_46] : memref<4x4x8x128xf32, #tpu.memory_space<any>> -> memref<4x1x8x128xf32, #tpu.memory_space<any>>
    %31 = tpu.memref_squeeze %30 : memref<4x1x8x128xf32, #tpu.memory_space<any>> -> memref<4x8x128xf32, #tpu.memory_space<any>>
    %c0_i32_47 = arith.constant 0 : i32
    %c0_i32_48 = arith.constant 0 : i32
    %c0_i32_49 = arith.constant 0 : i32
    %32 = tpu.memref_slice %arg1[%c1_i32_42, %c0_i32_47, %c0_i32_48, %c0_i32_49] : memref<4x4x8x128xf32, #tpu.memory_space<any>> -> memref<1x4x8x128xf32, #tpu.memory_space<any>>
    %33 = tpu.memref_squeeze %32 : memref<1x4x8x128xf32, #tpu.memory_space<any>> -> memref<4x8x128xf32, #tpu.memory_space<any>>
    %34 = tpu.memref_slice %arg2[%c1_i32_43] : memref<4x!tpu.dma_semaphore, #tpu.memory_space<semaphore_mem>> -> memref<1x!tpu.dma_semaphore, #tpu.memory_space<semaphore_mem>>
    %35 = tpu.memref_squeeze %34 : memref<1x!tpu.dma_semaphore, #tpu.memory_space<semaphore_mem>> -> memref<!tpu.dma_semaphore, #tpu.memory_space<semaphore_mem>>
    tpu.wait_dma2 semaphore(%35 : memref<!tpu.dma_semaphore, #tpu.memory_space<semaphore_mem>>) src(%31 : memref<4x8x128xf32, #tpu.memory_space<any>>) dst(%33 : memref<4x8x128xf32, #tpu.memory_space<any>>)
    %c2_i32_50 = arith.constant 2 : i32
    %c2_i32_51 = arith.constant 2 : i32
    %c2_i32_52 = arith.constant 2 : i32
    %c0_i32_53 = arith.constant 0 : i32
    %c0_i32_54 = arith.constant 0 : i32
    %c0_i32_55 = arith.constant 0 : i32
    %36 = tpu.memref_slice %arg0[%c0_i32_53, %c2_i32_50, %c0_i32_54, %c0_i32_55] : memref<4x4x8x128xf32, #tpu.memory_space<any>> -> memref<4x1x8x128xf32, #tpu.memory_space<any>>
    %37 = tpu.memref_squeeze %36 : memref<4x1x8x128xf32, #tpu.memory_space<any>> -> memref<4x8x128xf32, #tpu.memory_space<any>>
    %c0_i32_56 = arith.constant 0 : i32
    %c0_i32_57 = arith.constant 0 : i32
    %c0_i32_58 = arith.constant 0 : i32
    %38 = tpu.memref_slice %arg1[%c2_i32_51, %c0_i32_56, %c0_i32_57, %c0_i32_58] : memref<4x4x8x128xf32, #tpu.memory_space<any>> -> memref<1x4x8x128xf32, #tpu.memory_space<any>>
    %39 = tpu.memref_squeeze %38 : memref<1x4x8x128xf32, #tpu.memory_space<any>> -> memref<4x8x128xf32, #tpu.memory_space<any>>
    %40 = tpu.memref_slice %arg2[%c2_i32_52] : memref<4x!tpu.dma_semaphore, #tpu.memory_space<semaphore_mem>> -> memref<1x!tpu.dma_semaphore, #tpu.memory_space<semaphore_mem>>
    %41 = tpu.memref_squeeze %40 : memref<1x!tpu.dma_semaphore, #tpu.memory_space<semaphore_mem>> -> memref<!tpu.dma_semaphore, #tpu.memory_space<semaphore_mem>>
    tpu.wait_dma2 semaphore(%41 : memref<!tpu.dma_semaphore, #tpu.memory_space<semaphore_mem>>) src(%37 : memref<4x8x128xf32, #tpu.memory_space<any>>) dst(%39 : memref<4x8x128xf32, #tpu.memory_space<any>>)
    %c3_i32_59 = arith.constant 3 : i32
    %c3_i32_60 = arith.constant 3 : i32
    %c3_i32_61 = arith.constant 3 : i32
    %c0_i32_62 = arith.constant 0 : i32
    %c0_i32_63 = arith.constant 0 : i32
    %c0_i32_64 = arith.constant 0 : i32
    %42 = tpu.memref_slice %arg0[%c0_i32_62, %c3_i32_59, %c0_i32_63, %c0_i32_64] : memref<4x4x8x128xf32, #tpu.memory_space<any>> -> memref<4x1x8x128xf32, #tpu.memory_space<any>>
    %43 = tpu.memref_squeeze %42 : memref<4x1x8x128xf32, #tpu.memory_space<any>> -> memref<4x8x128xf32, #tpu.memory_space<any>>
    %c0_i32_65 = arith.constant 0 : i32
    %c0_i32_66 = arith.constant 0 : i32
    %c0_i32_67 = arith.constant 0 : i32
    %44 = tpu.memref_slice %arg1[%c3_i32_60, %c0_i32_65, %c0_i32_66, %c0_i32_67] : memref<4x4x8x128xf32, #tpu.memory_space<any>> -> memref<1x4x8x128xf32, #tpu.memory_space<any>>
    %45 = tpu.memref_squeeze %44 : memref<1x4x8x128xf32, #tpu.memory_space<any>> -> memref<4x8x128xf32, #tpu.memory_space<any>>
    %46 = tpu.memref_slice %arg2[%c3_i32_61] : memref<4x!tpu.dma_semaphore, #tpu.memory_space<semaphore_mem>> -> memref<1x!tpu.dma_semaphore, #tpu.memory_space<semaphore_mem>>
    %47 = tpu.memref_squeeze %46 : memref<1x!tpu.dma_semaphore, #tpu.memory_space<semaphore_mem>> -> memref<!tpu.dma_semaphore, #tpu.memory_space<semaphore_mem>>
    tpu.wait_dma2 semaphore(%47 : memref<!tpu.dma_semaphore, #tpu.memory_space<semaphore_mem>>) src(%43 : memref<4x8x128xf32, #tpu.memory_space<any>>) dst(%45 : memref<4x8x128xf32, #tpu.memory_space<any>>)
    return
  }
}

</mosaic_0001>

<bundles_post_ra>
// kernel: tpu_custom_call.1
= control target key start
LH: loop header
LB: loop body
LE: loop exit
PB: predicated region body
PF: predicated region fallthrough
CT: control target
= control target key end

     0   :  { %s152_s6 = smov 512   ;;  %s153_s7 = smov 128   ;;  %s202_s0 = inlined_call_operand.hbm [shape: f32[4,4,8,128], index: 0, kind: input, shape index: {}]   ;;  %s203_s1 = inlined_call_operand.hbm [shape: f32[4,4,8,128], index: 1, kind: output, shape index: {}]  }
   0x1   :  { %18 = sst [smem:[#allocation4]] %s152_s6  ;;  %s154_s8 = smov 8  }
   0x2   :  { %20 = sst [smem:[#allocation4 + $0x1]] %s153_s7  ;;  %s25_s11 = scalar_lea.hbm %s202_s0, 128 }
   0x3   :  { %22 = sst [smem:[#allocation4 + $0x2]] %s154_s8  ;;  %s155_s12 = smov [#allocation2]  }
   0x4   :  { %s156_s13 = smov [#allocation3]   ;;  %s157_s14 = smov 0  }
   0x5   :  { %24 = dma.general %s202_s0, 512, %s203_s1, %s155_s12, %s156_s13, [#allocation4], %s157_s14, 0  }
   0x6   :  { %40 = sst [smem:[#allocation6]] %s152_s6  ;;  %s26_s21 = scalar_lea.hbm %s203_s1, 512 }
   0x7   :  { %42 = sst [smem:[#allocation6 + $0x1]] %s153_s7  ;;  %s158_s22 = smov [#allocation2 + $0x1]  }
   0x8   :  { %44 = sst [smem:[#allocation6 + $0x2]] %s154_s8  ;;  %s159_s23 = smov [#allocation5]  }
   0x9   :  { %46 = dma.general %s25_s11, 512, %s26_s21, %s158_s22, %s159_s23, [#allocation6], %s157_s14, 0  }
   0xa   :  { %62 = sst [smem:[#allocation8]] %s152_s6  ;;  %s47_s26 = scalar_lea.hbm %s202_s0, 256 }
   0xb   :  { %64 = sst [smem:[#allocation8 + $0x1]] %s153_s7  ;;  %s48_s29 = scalar_lea.hbm %s203_s1, 1024 }
   0xc   :  { %66 = sst [smem:[#allocation8 + $0x2]] %s154_s8  ;;  %s69_s3 = scalar_lea.hbm %s202_s0, 384 }
   0xd   :  { %s160_s4 = smov [#allocation2 + $0x2]   ;;  %s161_s5 = smov [#allocation7]  }
   0xe   :  { %68 = dma.general %s47_s26, 512, %s48_s29, %s160_s4, %s161_s5, [#allocation8], %s157_s14, 0  }
   0xf   :  { %84 = sst [smem:[#allocation10]] %s152_s6  ;;  %s70_s11 = scalar_lea.hbm %s203_s1, 1536 }
  0x10   :  { %86 = sst [smem:[#allocation10 + $0x1]] %s153_s7  ;;  %s162_s12 = smov [#allocation2 + $0x3]  }
  0x11   :  { %88 = sst [smem:[#allocation10 + $0x2]] %s154_s8  ;;  %s163_s13 = smov [#allocation9]  }
  0x12   :  { %90 = dma.general %s69_s3, 512, %s70_s11, %s162_s12, %s163_s13, [#allocation10], %s157_s14, 0  }
  0x13   :  { %144 = dma.done.wait [#allocation2], 512 }
  0x14   :  { %145 = vsyncadd [#allocation2], 4294966784 }
  0x15   :  { %146 = dma.done.wait [#allocation2 + $0x1], 512 }
  0x16   :  { %147 = vsyncadd [#allocation2 + $0x1], 4294966784 }
  0x17   :  { %148 = dma.done.wait [#allocation2 + $0x2], 512 }
  0x18   :  { %149 = vsyncadd [#allocation2 + $0x2], 4294966784 }
  0x19   :  { %150 = dma.done.wait [#allocation2 + $0x3], 512 }
  0x1a   :  { %151 = vsyncadd [#allocation2 + $0x3], 4294966784 }
  0x1b   :  { %101 = vsyncmov [#allocation2] }
  0x1e   :  { %s102_s0 = vpop.sfrf %101 }
  0x1f   :  { %p128_p0 = scmp.ne.s32.totalorder %s102_s0, 0 }
  0x21   :  { %106 = shalt.err (%p128_p0)  }
  0x22   :  { %108 = vsyncmov [#allocation2 + $0x1] }
  0x25   :  { %s109_s6 = vpop.sfrf %108 }
  0x26   :  { %p129_p1 = scmp.ne.s32.totalorder %s109_s6, 0 }
  0x28   :  { %113 = shalt.err (%p129_p1)  }
  0x29   :  { %115 = vsyncmov [#allocation2 + $0x2] }
  0x2c   :  { %s116_s1 = vpop.sfrf %115 }
  0x2d   :  { %p130_p2 = scmp.ne.s32.totalorder %s116_s1, 0 }
  0x2f   :  { %120 = shalt.err (%p130_p2)  }
  0x30   :  { %122 = vsyncmov [#allocation2 + $0x3] }
  0x33   :  { %s123_s7 = vpop.sfrf %122 }
  0x34   :  { %p131_p3 = scmp.ne.s32.totalorder %s123_s7, 0 }
  0x36   :  { %127 = shalt.err (%p131_p3)  }

</bundles_post_ra>
